<compile_context>
chip_gen: v7x
topology: tpu7x:2x2x1
jax: 0.10.0
libtpu: 0.0.40
codegen_flags: <defaults>
</compile_context>

<pallas_src>
import functools
import math

import jax
import jax.numpy as jnp
from jax.experimental import pallas as pl
from jax.experimental.pallas import tpu as pltpu
from jax.scipy.special import erf as jax_erf  # exact erf for the pure-JAX reference


_SQRT_HALF = 1.0 / math.sqrt(2.0)


def _erf_approx(x):
    """erf via Abramowitz & Stegun 7.1.26 (|err| < 1.5e-7), Mosaic-lowerable.

    lax.erf has no guaranteed Mosaic lowering, so exact-gelu's erf is built from
    ops that do lower: VPU mul/add/abs/select, one EUP exp, one EUP reciprocal.
    Kernel-only helper (pl.reciprocal must run inside a pallas_call).
    """
    a1, a2, a3, a4, a5 = (0.254829592, -0.284496736, 1.421413741,
                          -1.453152027, 1.061405429)
    p = 0.3275911
    sign = jnp.where(x < 0.0, -1.0, 1.0)
    ax = jnp.abs(x)
    t = pl.reciprocal(1.0 + p * ax, approx=True)   # EUP slot, not a VPU divide
    poly = ((((a5 * t + a4) * t + a3) * t + a2) * t + a1) * t
    return sign * (1.0 - poly * jnp.exp(-ax * ax))


def mlm_head_kernel(x_ref, wd_ref, bd_ref, g_ref, beta_ref, et_ref, db_ref,
                    o_ref, h_ref, *, eps):
    # Vocab-tile index 0: compute the transform (dense -> gelu -> LayerNorm) for
    # this row tile once, cache it (bf16) in VMEM scratch for every vocab tile.
    @pl.when(pl.program_id(1) == 0)
    def _():
        x = x_ref[...].astype(jnp.bfloat16)                       # feed MXU bf16
        h = jnp.dot(x, wd_ref[...], preferred_element_type=jnp.float32)
        h = h + bd_ref[...].astype(jnp.float32)
        # exact (erf-based) gelu, f32 VPU math
        h = h * 0.5 * (1.0 + _erf_approx(h * _SQRT_HALF))
        # BertLayerNorm (TF style, eps inside rsqrt), one-pass stats
        m = jnp.mean(h, axis=-1, keepdims=True)
        m2 = jnp.mean(h * h, axis=-1, keepdims=True)
        var = jnp.maximum(m2 - m * m, 0.0)     # clamp (zero-padded rows -> var 0)
        h = (h - m) * jax.lax.rsqrt(var + eps)
        h = h * g_ref[...].astype(jnp.float32) + beta_ref[...].astype(jnp.float32)
        h_ref[...] = h.astype(h_ref.dtype)                        # bf16 scratch

    # Decoder: bf16 [tn, H] @ bf16 [H, tv] with f32 accumulation, + bias,
    # lane-dense store.
    logits = jnp.dot(h_ref[...], et_ref[...], preferred_element_type=jnp.float32)
    o_ref[...] = (logits + db_ref[...].astype(jnp.float32)).astype(o_ref.dtype)


def _round_up(x, m):
    return (x + m - 1) // m * m


def bert_only_mlm_head(sequence_output, dense_w_t, dense_b, ln_gamma, ln_beta,
                       decoder_w_t, decoder_b, *, eps=1e-12, tn=512, tv=1024,
                       vmem_limit_bytes=48 * 1024 * 1024):
    """BertOnlyMLMHead forward.

    sequence_output: [..., H]
    dense_w_t:       [H, H]   (PyTorch dense.weight transposed)
    dense_b:         [H]
    ln_gamma/beta:   [H]
    decoder_w_t:     [H, V]   (tied embedding weight [V, H] transposed)
    decoder_b:       [V]
    returns:         [..., V] in sequence_output.dtype

    MXU operands (dense_w_t, decoder_w_t, cached transform) are cast to bf16;
    accumulation and all VPU math stay f32.
    """
    H = sequence_output.shape[-1]
    lead = sequence_output.shape[:-1]
    x = sequence_output.reshape(-1, H)
    N = x.shape[0]
    V = decoder_w_t.shape[-1]
    out_dtype = sequence_output.dtype

    # Row tile: multiple of 16 (bf16 sublane minimum). Vocab tile: multiple of 128.
    tn = min(tn, _round_up(N, 16))
    tv = min(tv, _round_up(V, 128))
    n_pad = _round_up(N, tn)
    v_pad = _round_up(V, tv)
    if n_pad != N:
        x = jnp.pad(x, ((0, n_pad - N), (0, 0)))
    if v_pad != V:
        decoder_w_t = jnp.pad(decoder_w_t, ((0, 0), (0, v_pad - V)))
        decoder_b = jnp.pad(decoder_b, ((0, v_pad - V),))

    # bf16 weights feed the MXU; small per-feature vectors stay f32, lane-dense.
    wd = dense_w_t.astype(jnp.bfloat16)
    et = decoder_w_t.astype(jnp.bfloat16)
    bd = dense_b.astype(jnp.float32).reshape(1, H)
    g = ln_gamma.astype(jnp.float32).reshape(1, H)
    be = ln_beta.astype(jnp.float32).reshape(1, H)
    db = decoder_b.astype(jnp.float32).reshape(1, v_pad)

    grid = (n_pad // tn, v_pad // tv)
    kernel = functools.partial(mlm_head_kernel, eps=eps)

    out = pl.pallas_call(
        kernel,
        out_shape=jax.ShapeDtypeStruct((n_pad, v_pad), out_dtype),
        grid_spec=pltpu.PrefetchScalarGridSpec(
            num_scalar_prefetch=0,
            grid=grid,
            in_specs=[
                pl.BlockSpec((tn, H), lambda i, j: (i, 0)),   # x rows
                pl.BlockSpec((H, H), lambda i, j: (0, 0)),    # dense weight (bf16, resident)
                pl.BlockSpec((1, H), lambda i, j: (0, 0)),    # dense bias
                pl.BlockSpec((1, H), lambda i, j: (0, 0)),    # LN gamma
                pl.BlockSpec((1, H), lambda i, j: (0, 0)),    # LN beta
                pl.BlockSpec((H, tv), lambda i, j: (0, j)),   # decoder weight tile (bf16)
                pl.BlockSpec((1, tv), lambda i, j: (0, j)),   # decoder bias tile
            ],
            out_specs=pl.BlockSpec((tn, tv), lambda i, j: (i, j)),
            scratch_shapes=[pltpu.VMEM((tn, H), jnp.bfloat16)],  # cached transform
        ),
        compiler_params=pltpu.CompilerParams(
            dimension_semantics=("parallel", "arbitrary"),
            vmem_limit_bytes=vmem_limit_bytes),
    )(x, wd, bd, g, be, et, db)

    return out[:N, :V].reshape(*lead, V)


if __name__ == "__main__":
    # Small shapes consistent with the module: batch=2, seq=8, hidden=32, vocab=512.
    B, S, H, V = 2, 8, 32, 512
    eps = 1e-12
    key = jax.random.PRNGKey(0)
    ks = jax.random.split(key, 7)

    seq_out = jax.random.normal(ks[0], (B, S, H), dtype=jnp.float32)
    bound = 1.0 / math.sqrt(H)
    dense_w = jax.random.uniform(ks[1], (H, H), minval=-bound, maxval=bound,
                                 dtype=jnp.float32)          # PyTorch [out, in]
    dense_b = jax.random.uniform(ks[2], (H,), minval=-bound, maxval=bound,
                                 dtype=jnp.float32)
    ln_gamma = 1.0 + 0.1 * jax.random.normal(ks[3], (H,), dtype=jnp.float32)
    ln_beta = 0.1 * jax.random.normal(ks[4], (H,), dtype=jnp.float32)
    emb_w = 0.02 * jax.random.normal(ks[5], (V, H), dtype=jnp.float32)  # tied decoder [V, H]
    dec_b = 0.02 * jax.random.normal(ks[6], (V,), dtype=jnp.float32)

    # Small tiles here just to exercise the (rows x vocab) grid: grid = (1, 4).
    out = bert_only_mlm_head(seq_out, dense_w.T, dense_b, ln_gamma, ln_beta,
                             emb_w.T, dec_b, eps=eps, tn=16, tv=128)
    out = jax.block_until_ready(out)

    # Pure-JAX f32 reference (exact erf gelu), matching the PyTorch module.
    xf = seq_out.reshape(-1, H)
    h = xf @ dense_w.T + dense_b
    h = h * 0.5 * (1.0 + jax_erf(h / jnp.sqrt(2.0)))
    u = h.mean(-1, keepdims=True)
    s = ((h - u) ** 2).mean(-1, keepdims=True)
    h = (h - u) / jnp.sqrt(s + eps)
    h = ln_gamma * h + ln_beta
    ref = (h @ emb_w.T + dec_b).reshape(B, S, V)

    assert out.shape == (B, S, V)
    # Tolerance covers bf16 MXU operands (weights + cached transform) vs the
    # all-f32 reference matmuls.
    max_err = float(jnp.max(jnp.abs(out - ref)))
    assert jnp.allclose(out, ref, atol=2e-2, rtol=2e-2), max_err

    print("KERNEL_OK")
</pallas_src>

<mosaic_0001>
module attributes {stable_mosaic.version = 11 : i64} {
  func.func @mlm_head_kernel(%arg0: i32, %arg1: i32, %arg2: memref<16x32xf32, #tpu.memory_space<vmem>>, %arg3: memref<32x32xbf16, #tpu.memory_space<vmem>>, %arg4: memref<1x32xf32, #tpu.memory_space<vmem>>, %arg5: memref<1x32xf32, #tpu.memory_space<vmem>>, %arg6: memref<1x32xf32, #tpu.memory_space<vmem>>, %arg7: memref<32x128xbf16, #tpu.memory_space<vmem>>, %arg8: memref<1x128xf32, #tpu.memory_space<vmem>>, %arg9: memref<16x128xf32, #tpu.memory_space<vmem>>, %arg10: memref<16x32xbf16, #tpu.memory_space<vmem>>) attributes {dimension_semantics = [#tpu.dimension_semantics<parallel>, #tpu.dimension_semantics<arbitrary>], iteration_bounds = array<i64: 1, 4>, scalar_prefetch = 0 : i64, scratch_operands = 1 : i64, tpu.core_type = #tpu.core_type<tc>, window_params = [{transform_indices = @transform_0, window_bounds = array<i64: 16, 32>}, {pipeline_mode = #tpu.pipeline_mode<synchronous>, transform_indices = @transform_1, window_bounds = array<i64: 32, 32>}, {pipeline_mode = #tpu.pipeline_mode<synchronous>, transform_indices = @transform_2, window_bounds = array<i64: 1, 32>}, {pipeline_mode = #tpu.pipeline_mode<synchronous>, transform_indices = @transform_3, window_bounds = array<i64: 1, 32>}, {pipeline_mode = #tpu.pipeline_mode<synchronous>, transform_indices = @transform_4, window_bounds = array<i64: 1, 32>}, {transform_indices = @transform_5, window_bounds = array<i64: 32, 128>}, {transform_indices = @transform_6, window_bounds = array<i64: 1, 128>}, {transform_indices = @transform_7, window_bounds = array<i64: 16, 128>}]} {
    %c0_i32 = arith.constant 0 : i32
    %0 = arith.cmpi eq, %arg1, %c0_i32 : i32
    %1 = arith.extui %0 : i1 to i32
    %c0_i32_0 = arith.constant 0 : i32
    %2 = arith.cmpi ne, %1, %c0_i32_0 : i32
    scf.if %2 {
      %c0_8 = arith.constant 0 : index
      %c0_9 = arith.constant 0 : index
      %10 = vector.load %arg2[%c0_8, %c0_9] : memref<16x32xf32, #tpu.memory_space<vmem>>, vector<16x32xf32>
      %11 = arith.truncf %10 : vector<16x32xf32> to vector<16x32xbf16>
      %c0_10 = arith.constant 0 : index
      %c0_11 = arith.constant 0 : index
      %12 = vector.load %arg3[%c0_10, %c0_11] : memref<32x32xbf16, #tpu.memory_space<vmem>>, vector<32x32xbf16>
      %cst_12 = arith.constant dense<0.000000e+00> : vector<16x32xf32>
      %13 = tpu.matmul %11, %12, %cst_12 {dimension_numbers = #tpu.dot_dimension_numbers<[1], [0], [0], [1], [0, 0, 1, 1], [], []>} : vector<16x32xbf16>, vector<32x32xbf16>, vector<16x32xf32> -> vector<16x32xf32>
      %c0_13 = arith.constant 0 : index
      %c0_14 = arith.constant 0 : index
      %14 = vector.load %arg4[%c0_13, %c0_14] : memref<1x32xf32, #tpu.memory_space<vmem>>, vector<1x32xf32>
      %15 = vector.broadcast %14 : vector<1x32xf32> to vector<16x32xf32>
      %16 = arith.addf %13, %15 : vector<16x32xf32>
      %cst_15 = arith.constant 5.000000e-01 : f32
      %17 = vector.broadcast %cst_15 : f32 to vector<16x32xf32>
      %18 = arith.mulf %16, %17 : vector<16x32xf32>
      %cst_16 = arith.constant 0.707106769 : f32
      %19 = vector.broadcast %cst_16 : f32 to vector<16x32xf32>
      %20 = arith.mulf %16, %19 : vector<16x32xf32>
      %cst_17 = arith.constant 0.000000e+00 : f32
      %21 = vector.broadcast %cst_17 : f32 to vector<16x32xf32>
      %22 = arith.cmpf olt, %20, %21 : vector<16x32xf32>
      %cst_18 = arith.constant -1.000000e+00 : f32
      %cst_19 = arith.constant 1.000000e+00 : f32
      %23 = vector.broadcast %cst_18 : f32 to vector<16x32xf32>
      %24 = vector.broadcast %cst_19 : f32 to vector<16x32xf32>
      %25 = arith.select %22, %23, %24 : vector<16x32xi1>, vector<16x32xf32>
      %26 = math.absf %20 : vector<16x32xf32>
      %cst_20 = arith.constant 0.327591091 : f32
      %27 = vector.broadcast %cst_20 : f32 to vector<16x32xf32>
      %28 = arith.mulf %27, %26 : vector<16x32xf32>
      %cst_21 = arith.constant 1.000000e+00 : f32
      %29 = vector.broadcast %cst_21 : f32 to vector<16x32xf32>
      %30 = arith.addf %29, %28 : vector<16x32xf32>
      %31 = tpu.reciprocal %30 {approx = true} : vector<16x32xf32> -> vector<16x32xf32>
      %cst_22 = arith.constant 1.06140542 : f32
      %32 = vector.broadcast %cst_22 : f32 to vector<16x32xf32>
      %33 = arith.mulf %32, %31 : vector<16x32xf32>
      %cst_23 = arith.constant -1.45315206 : f32
      %34 = vector.broadcast %cst_23 : f32 to vector<16x32xf32>
      %35 = arith.addf %33, %34 : vector<16x32xf32>
      %36 = arith.mulf %35, %31 : vector<16x32xf32>
      %cst_24 = arith.constant 1.42141378 : f32
      %37 = vector.broadcast %cst_24 : f32 to vector<16x32xf32>
      %38 = arith.addf %36, %37 : vector<16x32xf32>
      %39 = arith.mulf %38, %31 : vector<16x32xf32>
      %cst_25 = arith.constant -0.284496725 : f32
      %40 = vector.broadcast %cst_25 : f32 to vector<16x32xf32>
      %41 = arith.addf %39, %40 : vector<16x32xf32>
      %42 = arith.mulf %41, %31 : vector<16x32xf32>
      %cst_26 = arith.constant 0.254829586 : f32
      %43 = vector.broadcast %cst_26 : f32 to vector<16x32xf32>
      %44 = arith.addf %42, %43 : vector<16x32xf32>
      %45 = arith.mulf %44, %31 : vector<16x32xf32>
      %cst_27 = arith.constant 0.000000e+00 : f32
      %46 = vector.broadcast %cst_27 : f32 to vector<16x32xf32>
      %47 = arith.subf %46, %26 : vector<16x32xf32>
      %48 = arith.mulf %47, %26 : vector<16x32xf32>
      %49 = math.exp %48 : vector<16x32xf32>
      %50 = arith.mulf %45, %49 : vector<16x32xf32>
      %cst_28 = arith.constant 1.000000e+00 : f32
      %51 = vector.broadcast %cst_28 : f32 to vector<16x32xf32>
      %52 = arith.subf %51, %50 : vector<16x32xf32>
      %53 = arith.mulf %25, %52 : vector<16x32xf32>
      %cst_29 = arith.constant 1.000000e+00 : f32
      %54 = vector.broadcast %cst_29 : f32 to vector<16x32xf32>
      %55 = arith.addf %54, %53 : vector<16x32xf32>
      %56 = arith.mulf %18, %55 : vector<16x32xf32>
      %cst_30 = arith.constant dense<0.000000e+00> : vector<16xf32>
      %57 = vector.multi_reduction <add>, %56, %cst_30 [1] : vector<16x32xf32> to vector<16xf32>
      %58 = vector.shape_cast %57 : vector<16xf32> to vector<16x1xf32>
      %cst_31 = arith.constant 3.200000e+01 : f32
      %59 = vector.broadcast %cst_31 : f32 to vector<16x1xf32>
      %60 = arith.divf %58, %59 : vector<16x1xf32>
      %61 = arith.mulf %56, %56 : vector<16x32xf32>
      %cst_32 = arith.constant dense<0.000000e+00> : vector<16xf32>
      %62 = vector.multi_reduction <add>, %61, %cst_32 [1] : vector<16x32xf32> to vector<16xf32>
      %63 = vector.shape_cast %62 : vector<16xf32> to vector<16x1xf32>
      %cst_33 = arith.constant 3.200000e+01 : f32
      %64 = vector.broadcast %cst_33 : f32 to vector<16x1xf32>
      %65 = arith.divf %63, %64 : vector<16x1xf32>
      %66 = arith.mulf %60, %60 : vector<16x1xf32>
      %67 = arith.subf %65, %66 : vector<16x1xf32>
      %cst_34 = arith.constant 0.000000e+00 : f32
      %68 = vector.broadcast %cst_34 : f32 to vector<16x1xf32>
      %69 = arith.maximumf %67, %68 : vector<16x1xf32>
      %70 = vector.broadcast %60 : vector<16x1xf32> to vector<16x32xf32>
      %71 = arith.subf %56, %70 : vector<16x32xf32>
      %cst_35 = arith.constant 9.99999996E-13 : f32
      %72 = vector.broadcast %cst_35 : f32 to vector<16x1xf32>
      %73 = arith.addf %69, %72 : vector<16x1xf32>
      %74 = math.rsqrt %73 : vector<16x1xf32>
      %75 = vector.broadcast %74 : vector<16x1xf32> to vector<16x32xf32>
      %76 = arith.mulf %71, %75 : vector<16x32xf32>
      %c0_36 = arith.constant 0 : index
      %c0_37 = arith.constant 0 : index
      %77 = vector.load %arg5[%c0_36, %c0_37] : memref<1x32xf32, #tpu.memory_space<vmem>>, vector<1x32xf32>
      %78 = vector.broadcast %77 : vector<1x32xf32> to vector<16x32xf32>
      %79 = arith.mulf %76, %78 : vector<16x32xf32>
      %c0_38 = arith.constant 0 : index
      %c0_39 = arith.constant 0 : index
      %80 = vector.load %arg6[%c0_38, %c0_39] : memref<1x32xf32, #tpu.memory_space<vmem>>, vector<1x32xf32>
      %81 = vector.broadcast %80 : vector<1x32xf32> to vector<16x32xf32>
      %82 = arith.addf %79, %81 : vector<16x32xf32>
      %83 = arith.truncf %82 : vector<16x32xf32> to vector<16x32xbf16>
      %c0_40 = arith.constant 0 : index
      %c0_41 = arith.constant 0 : index
      %84 = vector.load %arg10[%c0_40, %c0_41] : memref<16x32xbf16, #tpu.memory_space<vmem>>, vector<16x32xbf16>
      tpu.vector_store %arg10[%c0_40, %c0_41], %83 {strides = array<i32>} : memref<16x32xbf16, #tpu.memory_space<vmem>>, vector<16x32xbf16>,
    } else {
    }
    %c0 = arith.constant 0 : index
    %c0_1 = arith.constant 0 : index
    %3 = vector.load %arg10[%c0, %c0_1] : memref<16x32xbf16, #tpu.memory_space<vmem>>, vector<16x32xbf16>
    %c0_2 = arith.constant 0 : index
    %c0_3 = arith.constant 0 : index
    %4 = vector.load %arg7[%c0_2, %c0_3] : memref<32x128xbf16, #tpu.memory_space<vmem>>, vector<32x128xbf16>
    %cst = arith.constant dense<0.000000e+00> : vector<16x128xf32>
    %5 = tpu.matmul %3, %4, %cst {dimension_numbers = #tpu.dot_dimension_numbers<[1], [0], [0], [1], [0, 0, 1, 1], [], []>} : vector<16x32xbf16>, vector<32x128xbf16>, vector<16x128xf32> -> vector<16x128xf32>
    %c0_4 = arith.constant 0 : index
    %c0_5 = arith.constant 0 : index
    %6 = vector.load %arg8[%c0_4, %c0_5] : memref<1x128xf32, #tpu.memory_space<vmem>>, vector<1x128xf32>
    %7 = vector.broadcast %6 : vector<1x128xf32> to vector<16x128xf32>
    %8 = arith.addf %5, %7 : vector<16x128xf32>
    %c0_6 = arith.constant 0 : index
    %c0_7 = arith.constant 0 : index
    %9 = vector.load %arg9[%c0_6, %c0_7] : memref<16x128xf32, #tpu.memory_space<vmem>>, vector<16x128xf32>
    tpu.vector_store %arg9[%c0_6, %c0_7], %8 {strides = array<i32>} : memref<16x128xf32, #tpu.memory_space<vmem>>, vector<16x128xf32>,
    return
  }
  func.func @transform_0(%arg0: i32, %arg1: i32) -> (i32, i32) {
    %c0_i32 = arith.constant 0 : i32
    %c0_i32_0 = arith.constant 0 : i32
    return %arg0, %c0_i32 : i32, i32
  }
  func.func @transform_1(%arg0: i32, %arg1: i32) -> (i32, i32) {
    %c0_i32 = arith.constant 0 : i32
    %c0_i32_0 = arith.constant 0 : i32
    %c0_i32_1 = arith.constant 0 : i32
    return %c0_i32, %c0_i32_0 : i32, i32
  }
  func.func @transform_2(%arg0: i32, %arg1: i32) -> (i32, i32) {
    %c0_i32 = arith.constant 0 : i32
    %c0_i32_0 = arith.constant 0 : i32
    %c0_i32_1 = arith.constant 0 : i32
    return %c0_i32, %c0_i32_0 : i32, i32
  }
  func.func @transform_3(%arg0: i32, %arg1: i32) -> (i32, i32) {
    %c0_i32 = arith.constant 0 : i32
    %c0_i32_0 = arith.constant 0 : i32
    %c0_i32_1 = arith.constant 0 : i32
    return %c0_i32, %c0_i32_0 : i32, i32
  }
  func.func @transform_4(%arg0: i32, %arg1: i32) -> (i32, i32) {
    %c0_i32 = arith.constant 0 : i32
    %c0_i32_0 = arith.constant 0 : i32
    %c0_i32_1 = arith.constant 0 : i32
    return %c0_i32, %c0_i32_0 : i32, i32
  }
  func.func @transform_5(%arg0: i32, %arg1: i32) -> (i32, i32) {
    %c0_i32 = arith.constant 0 : i32
    %c0_i32_0 = arith.constant 0 : i32
    return %c0_i32, %arg1 : i32, i32
  }
  func.func @transform_6(%arg0: i32, %arg1: i32) -> (i32, i32) {
    %c0_i32 = arith.constant 0 : i32
    %c0_i32_0 = arith.constant 0 : i32
    return %c0_i32, %arg1 : i32, i32
  }
  func.func @transform_7(%arg0: i32, %arg1: i32) -> (i32, i32) {
    %c0_i32 = arith.constant 0 : i32
    return %arg0, %arg1 : i32, i32
  }
}

</mosaic_0001>

<bundles_post_ra>
// kernel: tpu_custom_call.1
= control target key start
LH: loop header
LB: loop body
LE: loop exit
PB: predicated region body
PF: predicated region fallthrough
CT: control target
= control target key end

     0   :  { %s1451_s0 = inlined_call_operand.hbm [shape: f32[16,32], index: 0, kind: input, shape index: {}]   ;;  %s1452_s1 = inlined_call_operand.hbm [shape: bf16[32,32], index: 1, kind: input, shape index: {}]   ;;  %s1453_s2 = inlined_call_operand.vmem [shape: f32[1,32], index: 2, kind: input, shape index: {}]   ;;  %s1454_s3 = inlined_call_operand.vmem [shape: f32[1,32], index: 3, kind: input, shape index: {}]   ;;  %s1455_s4 = inlined_call_operand.vmem [shape: f32[1,32], index: 4, kind: input, shape index: {}]   ;;  %s1456_s5 = inlined_call_operand.hbm [shape: bf16[32,512], index: 5, kind: input, shape index: {}]   ;;  %s1457_s6 = inlined_call_operand.vmem [shape: f32[1,512], index: 6, kind: input, shape index: {}]   ;;  %s1458_s7 = inlined_call_operand.hbm [shape: f32[16,512], index: 7, kind: output, shape index: {}]  }
   0x1   :  { %1467 = sst [smem:[#allocation16_spill]] %s1458_s7 }
   0x2   :  { %12 = vsyncpa [#allocation4], 0 }
   0x3   :  { %13 = vsyncpa [#allocation7], 0 }
   0x4   :  { %14 = vsyncpa [#allocation5], 0 }
   0x5   :  { %16 = vsyncpa [#allocation5 + $0x1], 0  ;;  %s1139_s24 = smov 0   ;;  %s1141_s25 = smov 0  }
   0x6   :  { %s1143_s26 = smov 0   ;;  %s1145_s27 = smov 0  }
   0x7   :  { %s1147_s28 = smov 0   ;;  %s1149_s29 = smov 0  }
   0x8 LB: > { %1468 = sst [smem:[#allocation14_spill]] %s1060_s24  ;;  %s1170_s30 = sadd.s32 4294967295, %s1080_s29   ;;  %s1080_s29 = sphi %s1149_s29, %s22_s29   ;;  %s1076_s28 = sphi %s1147_s28, %s1495_s28   ;;  %s1072_s27 = sphi %s1145_s27, %s1494_s27   ;;  %s1068_s26 = sphi %s1143_s26, %s1493_s26   ;;  %s1064_s25 = sphi %s1141_s25, %s1492_s25   ;;  %s1060_s24 = sphi %s1139_s24, %s1491_s24  }
   0x9   : > { %s743_s8 = sadd.s32 4294967294, %s1080_s29   ;;  %p158_p0 = scmp.ne.s32.totalorder %s1068_s26, %s1064_s25 }
   0xa   : > { %p159_p1 = scmp.eq.s32.totalorder %s1080_s29, 0  ;;  %p164_p2 = scmp.ne.s32.totalorder %s1064_s25, %s1060_s24 }
   0xb   : > { %p1459_p3 = scmp.eq.s32.totalorder %s1170_s30, 0  ;;  %p216_p4 = scmp.eq.s32.totalorder %s1170_s30, 3 }
   0xc   : > { %p1181_p5 = por %p159_p1, %p158_p0  ;;  %p222_p6 = scmp.eq.s32.totalorder %s743_s8, 3 }
   0xd   : > { %p1187_p7 = por %p1459_p3, %p164_p2  ;;  %p1191_p8 = por %p216_p4, %p158_p0 }
   0xe   : > { %p1195_p9 = por %p222_p6, %p164_p2  ;;  %p744_p10 = scmp.ge.s32.totalorder %s1080_s29, 1 }
   0xf   : > { %s1470_s11 = scalar_select %p1187_p7, 1, 0 }
  0x10   : > { %s1471_s12 = scalar_select %p1191_p8, 1, 0 }
  0x11   : > { %s1472_s13 = scalar_select %p1195_p9, 1, 0 }
  0x12   : > { %p229_p11 = scmp.lt.s32.totalorder %s1080_s29, 5  ;;  %s1082_s15 = smov [#allocation3]  }
  0x13   : > { %1473 = sst [smem:[#allocation15_spill]] %s1472_s13  ;;  %s244_s16 = sshll.u32 %s1082_s15, 4  ;;  %s1205_s16 = int_to_ptr.vmem [resolvable:$true] %s244_s16 }
  0x14   : > { %p1201_p12 = pnand %p744_p10, %p229_p11  ;;  %p821_p0 = scmp.lt.s32.totalorder %s1080_s29, 4 }
  0x15   : > { %s1083_s18 = smov [#allocation6]   ;;  %s904_s23 = scalar_lea.hbm %s1451_s0, 256 }
  0x16   : > { %s1474_s14 = scalar_select %p1201_p12, 1, 0 }
  0x17   : > { %p804_p13 = pneg %p1201_p12  ;;  %s257_s19 = sshll.u32 %s1083_s18, 4  ;;  %s1222_s19 = int_to_ptr.vmem [resolvable:$true] %s257_s19 }
  0x18   : > { %p1218_p2 = pnand %p821_p0, %p1181_p5  ;;  %p905_p4 = scmp.ne.s32.totalorder %s1451_s0, %s904_s23 }
  0x19   : > { %p1212_p1 = pnand %p804_p13, %p1459_p3  ;;  %p911_p5 = scmp.lt.u32.totalorder %s904_s23, %s1451_s0 }
  0x1b   : > { %p906_p6 = pneg %p1212_p1 }
  0x1d   : > { %p907_p10 = pnand %p906_p6, %p905_p4 }
  0x1f   : > { %p908_p11 = pneg %p907_p10 }
  0x21   : > { %p913_p13 = pnand %p911_p5, %p908_p11 }
  0x23   : > { %916 = shalt.err (!%p913_p13)
}
  0x24   : > { %s917_s21 = scalar_lea.vmem %s1205_s16, 256  ;;  %p925_p8 = scmp.lt.s32.totalorder %s1205_s16, %s1205_s16 }
  0x25   : > { %p918_p0 = scmp.ne.s32.totalorder %s1205_s16, %s917_s21  ;;  %p926_p4 = scmp.lt.s32.totalorder %s917_s21, %s917_s21 }
  0x27   : > { %p920_p3 = pnand %p918_p0, %p906_p6  ;;  %p927_p10 = por %p926_p4, %p925_p8 }
  0x29   : > { %p921_p9 = pneg %p920_p3 }
  0x2b   : > { %p928_p7 = pnand %p927_p10, %p921_p9 }
  0x2d   : > { %931 = shalt.err (!%p928_p7)
}
  0x2e   : > { %s1084_s22 = smov 128   ;;  %s1085_s23 = smov 8  }
  0x2f   : > { %807 = dma.hbm_to_vmem [thread:$0]  (!%p1212_p1), %s1451_s0, 256, %s1205_s16, [#allocation4], %s1084_s22, %s1084_s22, %s1085_s23  }
  0x30   : > { %s932_s9 = scalar_lea.hbm %s1452_s1, 256 }
  0x31   : > { %p933_p3 = scmp.ne.s32.totalorder %s1452_s1, %s932_s9  ;;  %p939_p9 = scmp.lt.u32.totalorder %s932_s9, %s1452_s1 }
  0x33   : > { %p935_p7 = pnand %p933_p3, %p906_p6 }
  0x35   : > { %p936_p8 = pneg %p935_p7 }
  0x37   : > { %p941_p11 = pnand %p939_p9, %p936_p8 }
  0x39   : > { %944 = shalt.err (!%p941_p11)
}
  0x3a   : > { %s945_s16 = scalar_lea.vmem %s1222_s19, 256  ;;  %p953_p4 = scmp.lt.s32.totalorder %s1222_s19, %s1222_s19 }
  0x3b   : > { %p946_p5 = scmp.ne.s32.totalorder %s1222_s19, %s945_s16  ;;  %p954_p10 = scmp.lt.s32.totalorder %s945_s16, %s945_s16 }
  0x3d   : > { %p948_p13 = pnand %p946_p5, %p906_p6  ;;  %p955_p3 = por %p954_p10, %p953_p4 }
  0x3f   : > { %p949_p0 = pneg %p948_p13 }
  0x41   : > { %p956_p7 = pnand %p955_p3, %p949_p0 }
  0x43   : > { %959 = shalt.err (!%p956_p7)
}
  0x44   : > { %s1465_s7 = smov 64   ;;  %s1087_s24 = smov 4  }
  0x45   : > { %810 = dma.hbm_to_vmem [thread:$0]  (!%p1212_p1), %s1452_s1, 256, %s1222_s19, [#allocation7], %s1465_s7, %s1465_s7, %s1087_s24  }
  0x46   : > { %s280_s22 = sand.u32 1, %s1080_s29   ;;  %s31_s23 = sadd.s32 1, %s1076_s28 }
  0x47   : > { %s282_s8 = sand.u32 1, %s1068_s26   ;;  %p32_p6 = scmp.ge.s32.totalorder %s31_s23, 4 }
  0x48   : > { %s748_s15 = sshll.u32 %s282_s8, 4  ;;  %s749_s10 = sshll.u32 %s1076_s28, 6 }
  0x49   : > { %s1497_s23 = smov (%p32_p6, %s31_s23), 0  ;;  %s1288_s17 = scalar_lea.hbm %s1456_s5, %s749_s10 }
  0x4a   : > { %s284_s19 = scalar_lea.vmem [#allocation8], %s748_s15  ;;  %s148_s9 = ssub.s32 %s1076_s28, %s1497_s23 }
  0x4b   : > { %s290_s16 = sshll.u32 %s284_s19, 4  ;;  %p1294_p1 = scmp.eq.s32.totalorder %s148_s9, 0  ;;  %s1292_s16 = int_to_ptr.vmem [resolvable:$true] %s290_s16 }
  0x4c   : > { %s1298_s8 = scalar_lea.sflag [#allocation4], %s280_s22  ;;  %s960_s7 = scalar_lea.hbm %s1288_s17, 256 }
  0x4d   : > { %p961_p8 = scmp.ne.s32.totalorder %s1288_s17, %s960_s7  ;;  %p962_p9 = pneg %p1218_p2 }
  0x4e   : > { %s965_s18 = scalar_lea.hbm %s1456_s5, 1024  ;;  %p966_p13 = scmp.lt.u32.totalorder %s1288_s17, %s1456_s5 }
  0x4f   : > { %p963_p11 = pnand %p962_p9, %p961_p8  ;;  %p967_p0 = scmp.lt.u32.totalorder %s965_s18, %s960_s7 }
  0x50   : > { %p969_p10 = scmp.lt.u32.totalorder %s960_s7, %s1288_s17 }
  0x51   : > { %p964_p5 = pneg %p963_p11  ;;  %p968_p4 = por %p967_p0, %p966_p13 }
  0x53   : > { %p970_p3 = por %p969_p10, %p968_p4 }
  0x55   : > { %p971_p7 = pnand %p970_p3, %p964_p5 }
  0x57   : > { %974 = shalt.err (!%p971_p7)
}
  0x58   : > { %s975_s22 = scalar_lea.vmem %s1292_s16, 256  ;;  %s1088_s9 = smov [#allocation8]  }
  0x59   : > { %p976_p6 = scmp.ne.s32.totalorder %s1292_s16, %s975_s22  ;;  %s980_s10 = sshll.u32 %s1088_s9, 4  ;;  %s981_s10 = int_to_ptr.vmem [resolvable:$false] %s980_s10 }
  0x5a   : > { %s982_s15 = scalar_lea.vmem %s981_s10, 512  ;;  %p983_p12 = scmp.lt.s32.totalorder %s1292_s16, %s981_s10 }
  0x5b   : > { %p978_p8 = pnand %p976_p6, %p962_p9  ;;  %p984_p13 = scmp.lt.s32.totalorder %s982_s15, %s975_s22 }
  0x5d   : > { %p979_p11 = pneg %p978_p8  ;;  %p985_p0 = por %p984_p13, %p983_p12 }
  0x5f   : > { %p986_p4 = pnand %p985_p0, %p979_p11 }
  0x61   : > { %989 = shalt.err (!%p986_p4)
}
  0x62   : > { %s1089_s7 = smov 256   ;;  %s1478_s18 = smov 64  }
  0x63   : > { %814 = dma.hbm_to_vmem [thread:$0]  (!%p1218_p2), %s1288_s17, 256, %s1292_s16, %s1298_s8, %s1089_s7, %s1478_s18, %s1087_s24  }
  0x64   : > { %s1479_s21 = sadd.s32 1, %s1068_s26  ;;  %p1480_p12 = scmp.ne.s32.totalorder %s1474_s14, 0 }
  0x65   : > { %s1333_s19 = scalar_select %p1294_p1, %s1068_s26, %s1479_s21  }
  0x66   : > { %308 = sbr.rel (%p1480_p12) target bundleno = 810 (0x32a), region = 48  ;;  %p1481_p9 = scmp.eq.s32.totalorder (!%p1480_p12), %s1170_s30, 0 }
  0x6d   : > { %1043 = dma.done.wait (%p1481_p9), [#allocation4], 256   ;;  %p1482_p5 = pmov %p1481_p9 }
  0x6f   : > { %1045 = vsyncadd (%p1482_p5), [#allocation4], 4294967040  ;;  %p1483_p10 = pmov %p1482_p5 }
  0x70   : > { %p1484_p3 = pmov %p1482_p5 }
  0x71   : > { %1047 = dma.done.wait (%p1483_p10), [#allocation7], 256  }
  0x72   : > { %1049 = vsyncadd (%p1484_p3), [#allocation7], 4294967040  ;;  %s318_s20 = sand.u32 1, %s1170_s30   ;;  %s320_s24 = sand.u32 1, %s1064_s25  }
  0x73   : > { %s1349_s14 = sshll.u32 %s320_s24, 4  ;;  %s319_s17 = scalar_lea.sflag [#allocation4], %s318_s20 }
  0x74   : > { %s322_s16 = scalar_lea.vmem [#allocation8], %s1349_s14  ;;  %p1485_p2 = scmp.ne.s32.totalorder %s1470_s11, 0 }
  0x76   : > { %1051 = dma.done.wait (%p1485_p2), %s319_s17, 256  }
  0x77   : > { %1053 = vsyncadd (%p1485_p2), %s319_s17, 4294967040  ;;  %p357_p1 = scmp.lt.s32.totalorder %s1072_s27, 3  ;;  %s1365_s9 = scalar_lea.vmem [#allocation9], %s1349_s14 }
  0x78   : > { %p755_p7 = scmp.ne.s32.totalorder %s1072_s27, 0 }
  0x79   : > { %s1358_s13 = scalar_select %p357_p1, %s1072_s27, 3 }
  0x7a   : > { %365 = sbr.rel (%p755_p7) target bundleno = 569 (0x239), region = 64  ;;  %v888_v0 = vld [vmem:[#allocation6] sm:$0xff] (!%p755_p7)   ;;  %v1090_v1 = vmov (!%p755_p7), 0.0   ;;  %v889_v2 = vld [vmem:[#allocation6 + $0x8] sm:$0xff] (!%p755_p7)   ;;  %vm1091_vm0 = vmmov (!%p755_p7), 0   ;;  %v366_v3 = vld [vmem:[#allocation3] sm:$0xff] (!%p755_p7) }
  0x7b   : > { %s359_s22 = scalar_lea.vmem %s1457_s6, %s1358_s13  ;;  %776 = vmatprep.subr.bf16.mxu0 (!%p755_p7), %v1090_v1  ;;  %780 = vmatprep.mubr.msk.bf16.mxu0 (!%p755_p7), %vm1091_vm0, %v1090_v1  ;;  %v367_v4 = vld [vmem:[#allocation3 + $0x8] sm:$0xff] (!%p755_p7)  ;;  %vm392_vm1 = vcmask (!%p755_p7), 261120   ;;  %v756_v6 = vld [vmem:[%s1453_s2] ss:$0 sm:$0xff] (!%p755_p7)  ;;  %v1092_v51 = vmov (!%p755_p7), 1.0  }
  0x7c   : > { %777 = vmatpush3.bf16.msra.mxu0 (!%p755_p7), %v888_v0  ;;  %v368_v5 = vpack.c.bf16 (!%p755_p7), %v367_v4, %v366_v3 }
  0x7d   : > { %778 = vmatprep.subr.bf16.mxu0 (!%p755_p7), %v1090_v1 }
  0x80   : > { %779 = vmatpush3.bf16.msra.mxu0 (!%p755_p7), %v889_v2 }
  0x83   : > { %781 = vmatmul.mubr.msk.bf16.vlgmr.msra.gmra.mrb[0].mxu0 %vm392_vm1, %v368_v5 }
 0x156   : > { %v430_v7 = vpop.f32.mrb[0].mxu0 }
 0x157   : > { %v431_v8 = vadd.f32 %v756_v6, %v430_v7  ;;  %v782_v9 = vpop.f32.mrb[1].mxu0 }
 0x158   : > { %v433_v10 = vpop.f32.mrb[2].mxu0 }
 0x159   : > { %v439_v11 = vmul.f32 0.70710677, %v431_v8  ;;  %v434_v12 = vadd.f32 %v756_v6, %v433_v10  ;;  %v783_v13 = vpop.f32.mrb[3].mxu0  ;;  %v437_v56 = vmul.f32 0.5, %v431_v8 }
 0x15b   : > { %v445_v14 = vand.u32 2147483647, %v439_v11  ;;  %v440_v15 = vmul.f32 0.70710677, %v434_v12  ;;  %vm441_vm2 = vcmp.lt.f32.partialorder %v439_v11, 0.0  ;;  %v438_v61 = vmul.f32 0.5, %v434_v12 }
 0x15c   : > { %v443_v52 = vsel %vm441_vm2, -1.0, %v1092_v51 }
 0x15d   : > { %v447_v16 = vmul.f32 0.3275911, %v445_v14  ;;  %v446_v17 = vand.u32 2147483647, %v440_v15  ;;  %v471_v21 = vsub.f32 0.0, %v445_v14  ;;  %vm442_vm3 = vcmp.lt.f32.partialorder %v440_v15, 0.0 }
 0x15e   : > { %v444_v57 = vsel %vm442_vm3, -1.0, %v1092_v51 }
 0x15f   : > { %v449_v18 = vadd.f32 1.0, %v447_v16  ;;  %v448_v19 = vmul.f32 0.3275911, %v446_v17  ;;  %v472_v22 = vsub.f32 0.0, %v446_v17  ;;  %v473_v24 = vmul.f32 %v471_v21, %v445_v14 }
 0x161   : > { %890 = vrcp.f32 %v449_v18  ;;  %v450_v20 = vadd.f32 1.0, %v448_v19  ;;  %v474_v28 = vmul.f32 %v472_v22, %v446_v17  ;;  %v475_v29 = vmul.f32 1.442695, %v473_v24 }
 0x163   : > { %892 = vrcp.f32 %v450_v20  ;;  %v477_v34 = vmul.f32 1.442695, %v474_v28 }
 0x164   : > { %894 = vpow2.f32 %v475_v29 }
 0x165   : > { %896 = vpow2.f32 %v477_v34 }
 0x16b   : > { %v891_v23 = vpop.eup %890 }
 0x16c   : > { %v453_v25 = vmul.f32 1.0614054, %v891_v23 }
 0x16d   : > { %v893_v26 = vpop.eup %892 }
 0x16e   : > { %v455_v27 = vadd.f32 -1.4531521, %v453_v25  ;;  %v454_v30 = vmul.f32 1.0614054, %v893_v26  ;;  %v895_v45 = vpop.eup %894  ;;  %v760_v25 = vld [vmem:[%s1454_s3] ss:$0 sm:$0xff] }
 0x16f   : > { %v897_v49 = vpop.eup %896 }
 0x170   : > { %v457_v31 = vmul.f32 %v891_v23, %v455_v27  ;;  %v456_v32 = vadd.f32 -1.4531521, %v454_v30  ;;  %v761_v30 = vld [vmem:[%s1455_s4] ss:$0 sm:$0xff] }
 0x172   : > { %v459_v33 = vadd.f32 1.4214138, %v457_v31  ;;  %v458_v35 = vmul.f32 %v893_v26, %v456_v32 }
 0x174   : > { %v461_v36 = vmul.f32 %v891_v23, %v459_v33  ;;  %v460_v37 = vadd.f32 1.4214138, %v458_v35 }
 0x176   : > { %v463_v38 = vadd.f32 -0.28449672, %v461_v36  ;;  %v462_v39 = vmul.f32 %v893_v26, %v460_v37 }
 0x178   : > { %v465_v40 = vmul.f32 %v891_v23, %v463_v38  ;;  %v464_v41 = vadd.f32 -0.28449672, %v462_v39 }
 0x17a   : > { %v467_v42 = vadd.f32 0.2548296, %v465_v40  ;;  %v466_v43 = vmul.f32 %v893_v26, %v464_v41 }
 0x17c   : > { %v469_v44 = vmul.f32 %v891_v23, %v467_v42  ;;  %v468_v46 = vadd.f32 0.2548296, %v466_v43 }
 0x17e   : > { %v479_v47 = vmul.f32 %v895_v45, %v469_v44  ;;  %v470_v48 = vmul.f32 %v893_v26, %v468_v46 }
 0x180   : > { %v481_v50 = vsub.f32 1.0, %v479_v47  ;;  %v480_v53 = vmul.f32 %v897_v49, %v470_v48 }
 0x182   : > { %v483_v54 = vmul.f32 %v481_v50, %v443_v52  ;;  %v482_v55 = vsub.f32 1.0, %v480_v53 }
 0x184   : > { %v485_v58 = vadd.f32 1.0, %v483_v54  ;;  %v484_v59 = vmul.f32 %v482_v55, %v444_v57 }
 0x186   : > { %v487_v60 = vmul.f32 %v485_v58, %v437_v56  ;;  %v486_v62 = vadd.f32 1.0, %v484_v59 }
 0x188   : > { %v489_v63 = vsel %vm392_vm1, %v487_v60, 0.0  ;;  %v498_v0 = vmul.f32 %v487_v60, %v487_v60  ;;  %v488_v1 = vmul.f32 %v486_v62, %v438_v61 }
 0x189   : > { %490 = vadd.xlane.f32.xlu0 %v489_v63 }
 0x18a   : > { %v500_v2 = vsel %vm392_vm1, %v498_v0, 0.0  ;;  %v499_v3 = vmul.f32 %v488_v1, %v488_v1  ;;  %v492_v4 = vsel %vm392_vm1, %v488_v1, 0.0 }
 0x18b   : > { %501 = vadd.xlane.f32.xlu1 %v500_v2 }
 0x18c   : > { %v503_v5 = vsel %vm392_vm1, %v499_v3, 0.0 }
 0x18d   : > { %493 = vadd.xlane.f32.xlu0 %v492_v4 }
 0x18f   : > { %504 = vadd.xlane.f32.xlu1 %v503_v5 }
 0x216   : > { %v491_v6 = vpop.xlane.xlu0 %490 }
 0x217   : > { %v496_v7 = vmul.f32 0.03125, %v491_v6 }
 0x218   : > { %v502_v8 = vpop.xlane.xlu1 %501 }
 0x219   : > { %v508_v9 = vmul.f32 %v496_v7, %v496_v7  ;;  %v506_v10 = vmul.f32 0.03125, %v502_v8  ;;  %v514_v22 = vsub.f32 %v487_v60, %v496_v7 }
 0x21a   : > { %v494_v11 = vpop.xlane.xlu0 %493 }
 0x21b   : > { %v510_v12 = vsub.f32 %v506_v10, %v508_v9  ;;  %v497_v13 = vmul.f32 0.03125, %v494_v11 }
 0x21c   : > { %v505_v14 = vpop.xlane.xlu1 %504 }
 0x21d   : > { %v512_v15 = vmax.f32 %v510_v12, 0.0  ;;  %v509_v16 = vmul.f32 %v497_v13, %v497_v13  ;;  %v507_v17 = vmul.f32 0.03125, %v505_v14  ;;  %v515_v26 = vsub.f32 %v488_v1, %v497_v13 }
 0x21f   : > { %v516_v18 = vadd.f32 1e-12, %v512_v15  ;;  %v511_v19 = vsub.f32 %v507_v17, %v509_v16 }
 0x221   : > { %898 = vrsqrt.f32 %v516_v18  ;;  %v513_v20 = vmax.f32 %v511_v19, 0.0 }
 0x223   : > { %v517_v21 = vadd.f32 1e-12, %v513_v20 }
 0x225   : > { %900 = vrsqrt.f32 %v517_v21 }
 0x22b   : > { %v899_v23 = vpop.eup %898 }
 0x22c   : > { %v520_v24 = vmul.f32 %v899_v23, %v514_v22 }
 0x22e   : > { %v529_v28 = vmul.f32 %v760_v25, %v520_v24 }
 0x22f   : > { %v901_v27 = vpop.eup %900 }
 0x230   : > { %v521_v29 = vmul.f32 %v901_v27, %v515_v26  ;;  %v538_v32 = vadd.f32 %v761_v30, %v529_v28 }
 0x232   : > { %v530_v31 = vmul.f32 %v760_v25, %v521_v29 }
 0x234   : > { %v539_v33 = vadd.f32 %v761_v30, %v530_v31 }
 0x236   : > { %v540_v34 = vpack.c.bf16 %v539_v33, %v538_v32 }
 0x238   : > { %541 = vst.msk [vmem:[#allocation2] sm:$0xff] %vm392_vm1, %v540_v34 }
 0x239 PF: > { %v902_v35 = vld [vmem:[%s322_s16] sm:$0xff]   ;;  %v1093_v36 = vmov 0.0   ;;  %v903_v37 = vld [vmem:[%s322_s16 + $0x8] sm:$0xff]   ;;  %vm1094_vm4 = vmmov 0   ;;  %vm566_vm5 = vcmask 261120   ;;  %s767_s30 = sshll.u32 %s1072_s27, 7 }
 0x23a   : > { %784 = vmatprep.subr.bf16.mxu0 %v1093_v36  ;;  %788 = vmatprep.mubr.msk.bf16.mxu0 %vm1094_vm4, %v1093_v36  ;;  %v762_v39 = vld [vmem:[%s359_s22] ss:$0 sm:$0xff]  ;;  %s629_s8 = sshll.u32 %s1365_s9, 4  ;;  %s1486_s11 = sld [smem:[#allocation16_spill]]  ;;  %s1399_s8 = int_to_ptr.vmem [resolvable:$true] %s629_s8 }
 0x23b   : > { %785 = vmatpush3.bf16.msra.mxu0 %v902_v35  ;;  %s1405_s27 = scalar_lea.sflag [#allocation5], %s320_s24  ;;  %s990_s13 = scalar_lea.vmem %s1399_s8, 256 }
 0x23c   : > { %786 = vmatprep.subr.bf16.mxu0 %v1093_v36  ;;  %p991_p6 = scmp.ne.s32.totalorder %s1399_s8, %s990_s13  ;;  %p1487_p8 = scmp.ne.s32.totalorder %s1471_s12, 0 }
 0x23d   : > { %s1095_s22 = smov [#allocation9]  }
 0x23e   : > { %p992_p11 = pnand %p991_p6, %p1487_p8  ;;  %s994_s15 = sshll.u32 %s1095_s22, 4  ;;  %s995_s15 = int_to_ptr.vmem [resolvable:$false] %s994_s15 }
 0x23f   : > { %787 = vmatpush3.bf16.msra.mxu0 %v903_v37  ;;  %v542_v38 = vld [vmem:[#allocation2] sm:$0xff]  ;;  %s996_s7 = scalar_lea.vmem %s995_s15, 512  ;;  %p997_p0 = scmp.lt.s32.totalorder %s1399_s8, %s995_s15 }
 0x240   : > { %s1397_s10 = scalar_lea.hbm %s1486_s11, %s767_s30  ;;  %p993_p13 = pneg %p992_p11 }
 0x241   : > { %p998_p4 = scmp.lt.s32.totalorder %s996_s7, %s990_s13 }
 0x242   : > { %789 = vmatmul.mubr.msk.bf16.vlgmr.msra.gmra.mrb[0].mxu0 %vm566_vm5, %v542_v38 }
 0x243   : > { %p999_p12 = por %p998_p4, %p997_p0 }
 0x245   : > { %p1000_p9 = pnand %p999_p12, %p993_p13 }
 0x315   : > { %v604_v40 = vpop.f32.mrb[0].mxu0 }
 0x316   : > { %v605_v41 = vadd.f32 %v762_v39, %v604_v40  ;;  %v790_v42 = vpop.f32.mrb[1].mxu0 }
 0x317   : > { %v607_v43 = vpop.f32.mrb[2].mxu0 }
 0x318   : > { %611 = vst [vmem:[%s1365_s9] sm:$0xff] %v605_v41  ;;  %v608_v44 = vadd.f32 %v762_v39, %v607_v43  ;;  %v791_v45 = vpop.f32.mrb[3].mxu0 }
 0x31a   : > { %612 = vst [vmem:[%s1365_s9 + $0x8] sm:$0xff] %v608_v44 }
 0x31b   : > { %1003 = shalt.err (!%p1000_p9)
}
 0x31c   : > { %s1004_s24 = scalar_lea.hbm %s1397_s10, 256  ;;  %s1008_s21 = scalar_lea.hbm %s1486_s11, 1024 }
 0x31d   : > { %p1005_p5 = scmp.ne.s32.totalorder %s1397_s10, %s1004_s24  ;;  %p1009_p2 = scmp.lt.u32.totalorder %s1397_s10, %s1486_s11 }
 0x31e   : > { %p1010_p1 = scmp.lt.u32.totalorder %s1008_s21, %s1004_s24  ;;  %p1012_p6 = scmp.lt.u32.totalorder %s1004_s24, %s1397_s10 }
 0x31f   : > { %p1006_p10 = pnand %p1005_p5, %p1487_p8 }
 0x320   : > { %p1011_p7 = por %p1010_p1, %p1009_p2 }
 0x321   : > { %p1007_p3 = pneg %p1006_p10 }
 0x322   : > { %p1013_p11 = por %p1012_p6, %p1011_p7 }
 0x324   : > { %p1014_p13 = pnand %p1013_p11, %p1007_p3 }
 0x326   : > { %1017 = shalt.err (!%p1014_p13)
}
 0x327   : > { %s1096_s30 = smov 128   ;;  %s1097_s14 = smov 512  }
 0x328   : > { %s1098_s16 = smov 8  }
 0x329   : > { %802 = dma.vmem_to_hbm [thread:$0]  (%p1487_p8), %s1399_s8, 256, %s1397_s10, %s1405_s27, %s1096_s30, %s1097_s14, %s1098_s16  }
 0x32a PF: > { %s1488_s13 = sld [smem:[#allocation14_spill]]  ;;  %s1489_s22 = sld [smem:[#allocation15_spill]] }
 0x32b   : > { %p824_p0 = scmp.ge.s32.totalorder %s1080_s29, 2 }
 0x330   : > { %s644_s15 = sand.u32 1, %s1488_s13   ;;  %p1490_p4 = scmp.ne.s32.totalorder %s1489_s22, 0 }
 0x331   : > { %s645_s7 = scalar_lea.sflag [#allocation5], %s644_s15 }
 0x332   : > { %p816_p12 = pnand %p824_p0, %p1490_p4 }
 0x334   : > { %1055 = dma.done.wait (!%p816_p12), %s645_s7, 256  }
 0x335   : > { %1057 = vsyncadd (!%p816_p12), %s645_s7, 4294967040  ;;  %s22_s29 = sadd.s32 1, %s1080_s29   ;;  %s1491_s24 = smov %s1064_s25 }
 0x336   : > { %p19_p9 = scmp.ge.s32.totalorder %s22_s29, 6   ;;  %s1492_s25 = smov %s1068_s26 }
 0x337   : > { %s1493_s26 = smov %s1333_s19  ;;  %s1494_s27 = smov %s1076_s28 }
 0x338   : > { %s1495_s28 = smov %s1497_s23  ;;  %21 = sbr.rel (!%p19_p9) target bundleno = 8 (0x8), region = 108 }
 0x33f   :  { %650 = vsyncpa [#allocation4], 1 }
 0x340   :  { %652 = vsyncpa [#allocation4 + $0x1], 1 }
 0x341   :  { %653 = vsyncpa [#allocation7], 1 }
 0x342   :  { %654 = vsyncpa [#allocation5], 1 }
 0x343   :  { %656 = vsyncpa [#allocation5 + $0x1], 1 }

</bundles_post_ra>
